<compile_context>
chip_gen: v7x
topology: tpu7x:2x2x1
jax: 0.10.0
libtpu: 0.0.40
codegen_flags: <defaults>
</compile_context>

<pallas_src>
import functools

import jax
import jax.numpy as jnp
from jax.experimental import pallas as pl
from jax.experimental.pallas import tpu as pltpu


def _mlloss_kernel(emb_ref, ker_ref, inv_e_ref, inv_k_ref, out_ref, *, s):
    # Single MXU matmul in the input dtype with f32 accumulation; the L2
    # normalizations are cheap per-row / per-column scales on the f32 result.
    cos = jnp.dot(emb_ref[...], ker_ref[...],
                  preferred_element_type=jnp.float32)
    cos = cos * inv_e_ref[...]          # (TM, 1) row scale: 1 / ||emb_row||
    cos = cos * inv_k_ref[...]          # (1, TN) col scale: 1 / ||W_col||
    out_ref[...] = (jnp.clip(cos, -1.0, 1.0) * s).astype(out_ref.dtype)


def _round_up(x, m):
    return ((x + m - 1) // m) * m


def _sublane_multiple(dtype):
    itemsize = jnp.dtype(dtype).itemsize
    if itemsize >= 4:
        return 8
    if itemsize == 2:
        return 16
    return 32


def ml_loss_forward(embeddings, kernel_weight, s=64.0, eps=1e-12,
                    matmul_dtype=None):
    """embeddings: (B, D); kernel_weight: (D, C) -> (B, C) scaled cosine logits."""
    B, D = embeddings.shape
    D2, C = kernel_weight.shape
    assert D == D2

    out_dtype = embeddings.dtype
    mm_dtype = (jnp.dtype(matmul_dtype) if matmul_dtype is not None
                else jnp.dtype(embeddings.dtype))

    # Hoisted normalization: tiny f32 inverse norms, computed once (fused
    # cast+square+reduce; eps on the squared norm avoids 0/0 NaNs).
    inv_e = jax.lax.rsqrt(
        jnp.sum(jnp.square(embeddings.astype(jnp.float32)),
                axis=1, keepdims=True) + eps)                     # (B, 1)
    inv_k = jax.lax.rsqrt(
        jnp.sum(jnp.square(kernel_weight.astype(jnp.float32)),
                axis=0, keepdims=True) + eps)                     # (1, C)

    emb_mm = embeddings.astype(mm_dtype)
    ker_mm = kernel_weight.astype(mm_dtype)

    # Pad B to the sublane multiple and C to a multiple of 128 (lane-dense
    # output tiles, unmasked stores).  Padded rows/cols are zero and sliced off.
    Bp = _round_up(B, _sublane_multiple(mm_dtype))
    Cp = _round_up(C, 128)
    if Bp != B:
        emb_mm = jnp.pad(emb_mm, ((0, Bp - B), (0, 0)))
        inv_e = jnp.pad(inv_e, ((0, Bp - B), (0, 0)), constant_values=1.0)
    if Cp != C:
        ker_mm = jnp.pad(ker_mm, ((0, 0), (0, Cp - C)))
        inv_k = jnp.pad(inv_k, ((0, 0), (0, Cp - C)), constant_values=1.0)

    # Tile selection: prioritize TM (sets how many times W is re-read from
    # HBM), then TN, against a VMEM budget safe for v7x's 64 MiB per-TC.
    mm_itemsize = mm_dtype.itemsize
    out_itemsize = jnp.dtype(out_dtype).itemsize
    budget = 36 * 1024 * 1024

    def footprint(tm, tn):
        # double-buffered inputs + output tile + inverse-norm slivers
        return 2 * ((tm * D + D * tn) * mm_itemsize
                    + tm * tn * out_itemsize
                    + (tm + tn) * 4)

    tm_cands = [Bp] + [t for t in (1024, 512, 256, 128, 64, 32, 16, 8)
                       if t < Bp and Bp % t == 0]
    tn_cands = [t for t in (1024, 512, 256, 128) if Cp % t == 0] or [Cp]

    tm, tn = tm_cands[-1], tn_cands[-1]
    found = False
    for tm_c in tm_cands:
        for tn_c in tn_cands:
            if footprint(tm_c, tn_c) <= budget:
                tm, tn = tm_c, tn_c
                found = True
                break
        if found:
            break

    grid = (Bp // tm, Cp // tn)   # j (class tiles) innermost: emb tile resident

    cost = pl.CostEstimate(
        flops=2 * Bp * Cp * D,
        transcendentals=0,
        bytes_accessed=(mm_itemsize * (Bp * D + grid[0] * D * Cp)
                        + out_itemsize * Bp * Cp
                        + 4 * (Bp + Cp)),
    )

    out_padded = pl.pallas_call(
        functools.partial(_mlloss_kernel, s=float(s)),
        out_shape=jax.ShapeDtypeStruct((Bp, Cp), out_dtype),
        grid_spec=pltpu.PrefetchScalarGridSpec(
            num_scalar_prefetch=0,
            grid=grid,
            in_specs=[
                # emb tile: unchanged across the innermost (j) axis -> reused.
                pl.BlockSpec((tm, D), lambda i, j: (i, 0)),
                # W column block: streamed along C, fed straight to the MXU.
                pl.BlockSpec((D, tn), lambda i, j: (0, j)),
                # Precomputed inverse norms (tiny).
                pl.BlockSpec((tm, 1), lambda i, j: (i, 0)),
                pl.BlockSpec((1, tn), lambda i, j: (0, j)),
            ],
            out_specs=pl.BlockSpec((tm, tn), lambda i, j: (i, j)),
        ),
        compiler_params=pltpu.CompilerParams(
            # i serial, j core-parallel: on v7x each TC streams a disjoint
            # half of W instead of duplicating the W HBM traffic.
            dimension_semantics=("arbitrary", "parallel"),
            vmem_limit_bytes=48 * 1024 * 1024,
        ),
        cost_estimate=cost,
    )(emb_mm, ker_mm, inv_e, inv_k)

    if Bp != B or Cp != C:
        out_padded = out_padded[:B, :C]
    return out_padded


def ml_loss_ref(embeddings, kernel_weight, s=64.0):
    emb_n = embeddings / jnp.linalg.norm(embeddings, axis=1, keepdims=True)
    ker_n = kernel_weight / jnp.linalg.norm(kernel_weight, axis=0, keepdims=True)
    return jnp.clip(emb_n @ ker_n, -1.0, 1.0) * s


if __name__ == "__main__":
    key = jax.random.PRNGKey(0)
    k_emb, k_ker, k_lbl = jax.random.split(key, 3)

    s = 64.0

    # Aligned small shapes: batch=16, embedding_dim=128, classes=256.
    B, D, C = 16, 128, 256
    embeddings = jax.random.normal(k_emb, (B, D), dtype=jnp.float32)
    kernel_weight = jax.random.normal(k_ker, (D, C), dtype=jnp.float32)
    # label is accepted by the PyTorch forward but unused in the returned value.
    label = jax.random.randint(k_lbl, (B,), 0, C)

    out = jax.block_until_ready(ml_loss_forward(embeddings, kernel_weight, s=s))
    ref = ml_loss_ref(embeddings, kernel_weight, s=s)
    assert out.shape == (B, C)
    assert jnp.allclose(out, ref, atol=1e-3, rtol=1e-4), "mismatch vs reference"

    # Unaligned shapes exercise the padding path (B=10 -> 16, C=200 -> 256).
    B2, C2 = 10, 200
    emb2 = jax.random.normal(k_emb, (B2, D), dtype=jnp.float32)
    ker2 = jax.random.normal(k_ker, (D, C2), dtype=jnp.float32)
    out2 = jax.block_until_ready(ml_loss_forward(emb2, ker2, s=s))
    ref2 = ml_loss_ref(emb2, ker2, s=s)
    assert out2.shape == (B2, C2)
    assert jnp.allclose(out2, ref2, atol=1e-3, rtol=1e-4), "mismatch vs reference (padded)"

    print("KERNEL_OK")
</pallas_src>

<mosaic_0001>
module attributes {stable_mosaic.version = 11 : i64} {
  func.func @_mlloss_kernel(%arg0: i32, %arg1: i32, %arg2: memref<16x128xf32, #tpu.memory_space<vmem>>, %arg3: memref<128x256xf32, #tpu.memory_space<vmem>>, %arg4: memref<16x1xf32, #tpu.memory_space<vmem>>, %arg5: memref<1x256xf32, #tpu.memory_space<vmem>>, %arg6: memref<16x256xf32, #tpu.memory_space<vmem>>) attributes {dimension_semantics = [#tpu.dimension_semantics<arbitrary>, #tpu.dimension_semantics<parallel>], iteration_bounds = array<i64: 1, 1>, scalar_prefetch = 0 : i64, scratch_operands = 0 : i64, tpu.core_type = #tpu.core_type<tc>, window_params = [{transform_indices = @transform_0, window_bounds = array<i64: 16, 128>}, {transform_indices = @transform_1, window_bounds = array<i64: 128, 256>}, {transform_indices = @transform_2, window_bounds = array<i64: 16, 1>}, {transform_indices = @transform_3, window_bounds = array<i64: 1, 256>}, {transform_indices = @transform_4, window_bounds = array<i64: 16, 256>}]} {
    %c0 = arith.constant 0 : index
    %c0_0 = arith.constant 0 : index
    %0 = vector.load %arg2[%c0, %c0_0] : memref<16x128xf32, #tpu.memory_space<vmem>>, vector<16x128xf32>
    %c0_1 = arith.constant 0 : index
    %c0_2 = arith.constant 0 : index
    %1 = vector.load %arg3[%c0_1, %c0_2] : memref<128x256xf32, #tpu.memory_space<vmem>>, vector<128x256xf32>
    %cst = arith.constant dense<0.000000e+00> : vector<16x256xf32>
    %2 = tpu.matmul %0, %1, %cst {dimension_numbers = #tpu.dot_dimension_numbers<[1], [0], [0], [1], [0, 0, 1, 1], [], []>} : vector<16x128xf32>, vector<128x256xf32>, vector<16x256xf32> -> vector<16x256xf32>
    %c0_3 = arith.constant 0 : index
    %c0_4 = arith.constant 0 : index
    %3 = vector.load %arg4[%c0_3, %c0_4] : memref<16x1xf32, #tpu.memory_space<vmem>>, vector<16x1xf32>
    %4 = vector.broadcast %3 : vector<16x1xf32> to vector<16x256xf32>
    %5 = arith.mulf %2, %4 : vector<16x256xf32>
    %c0_5 = arith.constant 0 : index
    %c0_6 = arith.constant 0 : index
    %6 = vector.load %arg5[%c0_5, %c0_6] : memref<1x256xf32, #tpu.memory_space<vmem>>, vector<1x256xf32>
    %7 = vector.broadcast %6 : vector<1x256xf32> to vector<16x256xf32>
    %8 = arith.mulf %5, %7 : vector<16x256xf32>
    %cst_7 = arith.constant -1.000000e+00 : f32
    %cst_8 = arith.constant 1.000000e+00 : f32
    %9 = vector.broadcast %cst_7 : f32 to vector<16x256xf32>
    %10 = arith.maximumf %9, %8 : vector<16x256xf32>
    %11 = vector.broadcast %cst_8 : f32 to vector<16x256xf32>
    %12 = arith.minimumf %11, %10 : vector<16x256xf32>
    %cst_9 = arith.constant 6.400000e+01 : f32
    %13 = vector.broadcast %cst_9 : f32 to vector<16x256xf32>
    %14 = arith.mulf %12, %13 : vector<16x256xf32>
    %c0_10 = arith.constant 0 : index
    %c0_11 = arith.constant 0 : index
    %15 = vector.load %arg6[%c0_10, %c0_11] : memref<16x256xf32, #tpu.memory_space<vmem>>, vector<16x256xf32>
    tpu.vector_store %arg6[%c0_10, %c0_11], %14 {strides = array<i32>} : memref<16x256xf32, #tpu.memory_space<vmem>>, vector<16x256xf32>,
    return
  }
  func.func @transform_0(%arg0: i32, %arg1: i32) -> (i32, i32) {
    %c0_i32 = arith.constant 0 : i32
    %c0_i32_0 = arith.constant 0 : i32
    return %arg0, %c0_i32 : i32, i32
  }
  func.func @transform_1(%arg0: i32, %arg1: i32) -> (i32, i32) {
    %c0_i32 = arith.constant 0 : i32
    %c0_i32_0 = arith.constant 0 : i32
    return %c0_i32, %arg1 : i32, i32
  }
  func.func @transform_2(%arg0: i32, %arg1: i32) -> (i32, i32) {
    %c0_i32 = arith.constant 0 : i32
    %c0_i32_0 = arith.constant 0 : i32
    return %arg0, %c0_i32 : i32, i32
  }
  func.func @transform_3(%arg0: i32, %arg1: i32) -> (i32, i32) {
    %c0_i32 = arith.constant 0 : i32
    %c0_i32_0 = arith.constant 0 : i32
    return %c0_i32, %arg1 : i32, i32
  }
  func.func @transform_4(%arg0: i32, %arg1: i32) -> (i32, i32) {
    %c0_i32 = arith.constant 0 : i32
    return %arg0, %arg1 : i32, i32
  }
}

</mosaic_0001>

<bundles_post_ra>
// kernel: tpu_custom_call.1
= control target key start
LH: loop header
LB: loop body
LE: loop exit
PB: predicated region body
PF: predicated region fallthrough
CT: control target
= control target key end

     0   :  { %9 = vsyncpa [#allocation3], 0  ;;  %s391_s0 = inlined_call_operand.vmem [shape: f32[16,128], index: 0, kind: input, shape index: {}]   ;;  %s392_s1 = inlined_call_operand.hbm [shape: f32[128,256], index: 1, kind: input, shape index: {}]   ;;  %s393_s2 = inlined_call_operand.vmem [shape: f32[16,1], index: 2, kind: input, shape index: {}]   ;;  %s394_s3 = inlined_call_operand.vmem [shape: f32[1,256], index: 3, kind: input, shape index: {}]   ;;  %s395_s4 = inlined_call_operand.hbm [shape: f32[16,256], index: 4, kind: output, shape index: {}]  }
   0x1   :  { %10 = vsyncpa [#allocation4], 0  ;;  %s315_s15 = smov [#allocation2]   ;;  %s267_s19 = scalar_lea.hbm %s392_s1, 4096 }
   0x2   :  { %s18_s16 = sshll.u32 %s315_s15, 4  ;;  %p268_p0 = scmp.ne.s32.totalorder %s392_s1, %s267_s19  ;;  %s19_s16 = int_to_ptr.vmem [resolvable:$true] %s18_s16 }
   0x3   :  { %p271_p1 = scmp.lt.u32.totalorder %s267_s19, %s392_s1 }
   0x5   :  { %p273_p2 = pnand %p271_p1, %p268_p0 }
   0x7   :  { %276 = shalt.err (!%p273_p2)
}
   0x8   :  { %s277_s24 = scalar_lea.vmem %s19_s16, 4096  ;;  %p282_p4 = scmp.lt.s32.totalorder %s19_s16, %s19_s16 }
   0x9   :  { %p278_p3 = scmp.ne.s32.totalorder %s19_s16, %s277_s24  ;;  %p283_p5 = scmp.lt.s32.totalorder %s277_s24, %s277_s24 }
   0xb   :  { %p284_p6 = por %p283_p5, %p282_p4 }
   0xd   :  { %p285_p7 = pnand %p284_p6, %p278_p3 }
   0xf   :  { %288 = shalt.err (!%p285_p7)
}
  0x10   :  { %s316_s25 = smov 256   ;;  %s317_s26 = smov 16  }
  0x11   :  { %24 = dma.hbm_to_vmem [thread:$0]  %s392_s1, 4096, %s19_s16, [#allocation3], %s316_s25, %s316_s25, %s317_s26  }
  0x12   :  { %311 = dma.done.wait [#allocation3], 4096  }
  0x13   :  { %312 = vsyncadd [#allocation3], 4294963200  ;;  %v318_v0 = vmov 0.0   ;;  %v319_v1 = vmov 0   ;;  %v35_v2 = vld [vmem:[#allocation2 + $0x8] sm:$0xff]  ;;  %v37_v3 = vld [vmem:[#allocation2 + $0x18] sm:$0xff]  ;;  %v161_v54 = vlaneseq }
  0x14   :  { %130 = vmatprep.mubr.f32.mxu0 %v318_v0  ;;  %136 = vmatprep.mubr.f32.mxu1 %v318_v0  ;;  %v34_v4 = vld [vmem:[#allocation2] sm:$0xff]  ;;  %v212_v5 = vpack.c.bf16 %v37_v3, %v35_v2  ;;  %v36_v6 = vld [vmem:[#allocation2 + $0x10] sm:$0xff]  ;;  %v39_v7 = vld [vmem:[#allocation2 + $0x28] sm:$0xff] }
  0x15   :  { %266 = vset.pattern.permute.xlu0 %v319_v1  ;;  %v41_v8 = vld [vmem:[#allocation2 + $0x38] sm:$0xff]  ;;  %v214_v9 = vpack.c.bf16 %v36_v6, %v34_v4  ;;  %v38_v11 = vld [vmem:[#allocation2 + $0x20] sm:$0xff]  ;;  %v40_v12 = vld [vmem:[#allocation2 + $0x30] sm:$0xff]  ;;  %v162_v55 = vshrl.u32 %v161_v54, 7 }
  0x16   :  { %v216_v10 = vpack.c.bf16 %v41_v8, %v39_v7  ;;  %v43_v13 = vld [vmem:[#allocation2 + $0x48] sm:$0xff]  ;;  %213 = vmatprep.subr.bf16.mxu0 %v212_v5  ;;  %244 = vmatprep.subr.bf16.mxu1 %v212_v5  ;;  %v45_v14 = vld [vmem:[#allocation2 + $0x58] sm:$0xff]  ;;  %v218_v15 = vpack.c.bf16 %v40_v12, %v38_v11  ;;  %v42_v17 = vld [vmem:[#allocation2 + $0x40] sm:$0xff] }
  0x17   :  { %215 = vmatpush1.bf16.msra.mxu0 %v214_v9  ;;  %252 = vmatpush1.bf16.msra.mxu1 %v214_v9  ;;  %v220_v16 = vpack.c.bf16 %v45_v14, %v43_v13  ;;  %v44_v18 = vld [vmem:[#allocation2 + $0x50] sm:$0xff]  ;;  %v47_v19 = vld [vmem:[#allocation2 + $0x68] sm:$0xff]  ;;  %v49_v20 = vld [vmem:[#allocation2 + $0x78] sm:$0xff]  ;;  %v163_v57 = vsub.s32 0, %v162_v55  ;;  %v167_v59 = vsub.s32 1, %v162_v55 }
  0x18   :  { %217 = vmatprep.subr.bf16.mxu0 %v216_v10  ;;  %245 = vmatprep.subr.bf16.mxu1 %v216_v10  ;;  %v222_v21 = vpack.c.bf16 %v44_v18, %v42_v17  ;;  %v224_v22 = vpack.c.bf16 %v49_v20, %v47_v19  ;;  %v46_v23 = vld [vmem:[#allocation2 + $0x60] sm:$0xff]  ;;  %v48_v24 = vld [vmem:[#allocation2 + $0x70] sm:$0xff]  ;;  %v51_v25 = vld [vmem:[#allocation2 + $0x88] sm:$0xff] }
  0x19   :  { %v53_v26 = vld [vmem:[#allocation2 + $0x98] sm:$0xff]  ;;  %v143_v27 = vld [vmem:[%s393_s2] sm:$0xff]  ;;  %v226_v28 = vpack.c.bf16 %v48_v24, %v46_v23  ;;  %v52_v31 = vld [vmem:[#allocation2 + $0x90] sm:$0xff] }
  0x1a   :  { %v228_v29 = vpack.c.bf16 %v53_v26, %v51_v25  ;;  %v50_v30 = vld [vmem:[#allocation2 + $0x80] sm:$0xff]  ;;  %v55_v32 = vld [vmem:[#allocation2 + $0xa8] sm:$0xff]  ;;  %v57_v33 = vld [vmem:[#allocation2 + $0xb8] sm:$0xff]  ;;  %147 = vperm.xlu0 %266, %v143_v27  }
  0x1b   :  { %219 = vmatpush1.bf16.msra.mxu0 %v218_v15  ;;  %253 = vmatpush1.bf16.msra.mxu1 %v218_v15  ;;  %v144_v34 = vld [vmem:[%s393_s2 + $0x8] sm:$0xff]  ;;  %v230_v35 = vpack.c.bf16 %v52_v31, %v50_v30  ;;  %v232_v36 = vpack.c.bf16 %v57_v33, %v55_v32  ;;  %v54_v37 = vld [vmem:[#allocation2 + $0xa0] sm:$0xff]  ;;  %v56_v38 = vld [vmem:[#allocation2 + $0xb0] sm:$0xff] }
  0x1c   :  { %221 = vmatprep.subr.bf16.mxu0 %v220_v16  ;;  %246 = vmatprep.subr.bf16.mxu1 %v220_v16  ;;  %v59_v39 = vld [vmem:[#allocation2 + $0xc8] sm:$0xff]  ;;  %v61_v40 = vld [vmem:[#allocation2 + $0xd8] sm:$0xff]  ;;  %v234_v41 = vpack.c.bf16 %v56_v38, %v54_v37  ;;  %v58_v43 = vld [vmem:[#allocation2 + $0xc0] sm:$0xff] }
  0x1d   :  { %v236_v42 = vpack.c.bf16 %v61_v40, %v59_v39  ;;  %v60_v44 = vld [vmem:[#allocation2 + $0xd0] sm:$0xff]  ;;  %v63_v45 = vld [vmem:[#allocation2 + $0xe8] sm:$0xff]  ;;  %v65_v46 = vld [vmem:[#allocation2 + $0xf8] sm:$0xff] }
  0x1e   :  { %152 = vperm.xlu0 %266, %v144_v34   ;;  %v238_v47 = vpack.c.bf16 %v60_v44, %v58_v43  ;;  %v240_v48 = vpack.c.bf16 %v65_v46, %v63_v45  ;;  %v62_v49 = vld [vmem:[#allocation2 + $0xe0] sm:$0xff]  ;;  %v64_v50 = vld [vmem:[#allocation2 + $0xf0] sm:$0xff]  ;;  %v33_v53 = vld [vmem:[%s391_s0 + $0x8] sm:$0xff] }
  0x1f   :  { %223 = vmatpush1.bf16.msra.mxu0 %v222_v21  ;;  %254 = vmatpush1.bf16.msra.mxu1 %v222_v21  ;;  %v242_v51 = vpack.c.bf16 %v64_v50, %v62_v49  ;;  %v32_v52 = vld [vmem:[%s391_s0] sm:$0xff]  ;;  %s320_s0 = smov [#allocation5]  }
  0x20   :  { %225 = vmatprep.subr.bf16.mxu0 %v224_v22  ;;  %247 = vmatprep.subr.bf16.mxu1 %v224_v22  ;;  %v159_v58 = vld [vmem:[%s394_s3] sm:$0x3]  ;;  %s196_s3 = sshll.u32 %s320_s0, 4  ;;  %s197_s3 = int_to_ptr.vmem [resolvable:$true] %s196_s3 }
  0x21   :  { %v164_v61 = vrot.slane %v159_v58, %v163_v57  ;;  %v168_v0 = vrot.slane %v159_v58, %v167_v59  ;;  %s289_s11 = scalar_lea.vmem %s197_s3, 512  ;;  %p294_p9 = scmp.lt.s32.totalorder %s197_s3, %s197_s3 }
  0x22   :  { %p290_p8 = scmp.ne.s32.totalorder %s197_s3, %s289_s11  ;;  %p295_p10 = scmp.lt.s32.totalorder %s289_s11, %s289_s11 }
  0x23   :  { %227 = vmatpush1.bf16.msra.mxu0 %v226_v28  ;;  %255 = vmatpush1.bf16.msra.mxu1 %v226_v28 }
  0x24   :  { %229 = vmatprep.subr.bf16.mxu0 %v228_v29  ;;  %248 = vmatprep.subr.bf16.mxu1 %v228_v29  ;;  %p296_p11 = por %p295_p10, %p294_p9 }
  0x26   :  { %p297_p12 = pnand %p296_p11, %p290_p8 }
  0x27   :  { %231 = vmatpush1.bf16.msra.mxu0 %v230_v35  ;;  %256 = vmatpush1.bf16.msra.mxu1 %v230_v35 }
  0x28   :  { %233 = vmatprep.subr.bf16.mxu0 %v232_v36  ;;  %249 = vmatprep.subr.bf16.mxu1 %v232_v36 }
  0x2b   :  { %235 = vmatpush1.bf16.msra.mxu0 %v234_v41  ;;  %257 = vmatpush1.bf16.msra.mxu1 %v234_v41 }
  0x2c   :  { %237 = vmatprep.subr.bf16.mxu0 %v236_v42  ;;  %250 = vmatprep.subr.bf16.mxu1 %v236_v42 }
  0x2f   :  { %239 = vmatpush1.bf16.msra.mxu0 %v238_v47  ;;  %258 = vmatpush1.bf16.msra.mxu1 %v238_v47 }
  0x30   :  { %241 = vmatprep.subr.bf16.mxu0 %v240_v48  ;;  %251 = vmatprep.subr.bf16.mxu1 %v240_v48 }
  0x33   :  { %243 = vmatpush1.bf16.msra.mxu0 %v242_v51  ;;  %259 = vmatpush1.bf16.msra.mxu1 %v242_v51 }
  0x36   :  { %131 = vmatmul.mubr.f32.vlgmr.msra.gmra.mrb[0].mxu0 %v32_v52  ;;  %137 = vmatmul.mubr.f32.vlgmr.msra.gmra.mrb[0].mxu1 %v33_v53 }
  0x99   :  { %v148_v56 = vpop.permute.xlu0 %147 }
  0x9d   :  { %v153_v60 = vpop.permute.xlu0 %152 }
 0x109   :  { %v132_v62 = vpop.f32.mrb[0].mxu0  ;;  %v138_v63 = vpop.f32.mrb[0].mxu1 }
 0x10a   :  { %v155_v1 = vmul.f32 %v148_v56, %v132_v62  ;;  %v157_v2 = vmul.f32 %v153_v60, %v138_v63  ;;  %v134_v3 = vpop.f32.mrb[1].mxu0  ;;  %v140_v4 = vpop.f32.mrb[1].mxu1 }
 0x10b   :  { %v156_v5 = vmul.f32 %v148_v56, %v134_v3  ;;  %v158_v6 = vmul.f32 %v153_v60, %v140_v4 }
 0x10c   :  { %v171_v7 = vmul.f32 %v164_v61, %v155_v1  ;;  %v173_v8 = vmul.f32 %v164_v61, %v157_v2 }
 0x10d   :  { %v172_v9 = vmul.f32 %v168_v0, %v156_v5  ;;  %v174_v10 = vmul.f32 %v168_v0, %v158_v6 }
 0x10e   :  { %v208_v11 = vclamps-f32 %v171_v7, 1.0  ;;  %v210_v12 = vclamps-f32 %v173_v8, 1.0 }
 0x10f   :  { %v209_v13 = vclamps-f32 %v172_v9, 1.0  ;;  %v211_v14 = vclamps-f32 %v174_v10, 1.0 }
 0x110   :  { %v183_v15 = vmul.f32 64.0, %v208_v11  ;;  %v185_v16 = vmul.f32 64.0, %v210_v12 }
 0x111   :  { %v184_v17 = vmul.f32 64.0, %v209_v13  ;;  %v186_v18 = vmul.f32 64.0, %v211_v14 }
 0x112   :  { %187 = vst [vmem:[#allocation5] sm:$0xff] %v183_v15  ;;  %189 = vst [vmem:[#allocation5 + $0x10] sm:$0xff] %v185_v16 }
 0x113   :  { %188 = vst [vmem:[#allocation5 + $0x8] sm:$0xff] %v184_v17  ;;  %190 = vst [vmem:[#allocation5 + $0x18] sm:$0xff] %v186_v18 }
 0x114   :  { %300 = shalt.err (!%p297_p12)
}
 0x115   :  { %s301_s14 = scalar_lea.hbm %s395_s4, 512 }
 0x116   :  { %p302_p13 = scmp.ne.s32.totalorder %s395_s4, %s301_s14  ;;  %p305_p0 = scmp.lt.u32.totalorder %s301_s14, %s395_s4 }
 0x118   :  { %p307_p1 = pnand %p305_p0, %p302_p13 }
 0x11a   :  { %310 = shalt.err (!%p307_p1)
}
 0x11b   :  { %202 = dma.vmem_to_hbm [thread:$0]  %s197_s3, 512, %s395_s4, [#allocation4], %s316_s25, %s316_s25, %s317_s26  }
 0x11c   :  { %313 = dma.done.wait [#allocation4], 512  }
 0x11d   :  { %314 = vsyncadd [#allocation4], 4294966784 }
 0x11e   :  { %206 = vsyncpa [#allocation3], 1 }
 0x11f   :  { %207 = vsyncpa [#allocation4], 1 }

</bundles_post_ra>
